<compile_context>
chip_gen: v7x
topology: tpu7x:2x2x1
jax: 0.10.0
libtpu: 0.0.40
codegen_flags: <defaults>
</compile_context>

<pallas_src>
import functools

import jax
import jax.numpy as jnp
from jax.experimental import pallas as pl
from jax.experimental.pallas import tpu as pltpu


def _round_up(x: int, m: int) -> int:
    return (x + m - 1) // m * m


def mlp_kernel(x_ref, w1_ref, b1_ref, w2_ref, b2_ref, o_ref):
    # In-kernel downcast of x to the weight compute dtype (bf16) for the MXU.
    x = x_ref[...].astype(w1_ref.dtype)
    # Layer 1: (TB, n_in) @ (n_in, n_hid_p), f32 accumulate on the MXU.
    h = jnp.dot(x, w1_ref[...], preferred_element_type=jnp.float32)
    # Bias + sigmoid in f32 (VPU/EUP); b1 is (1, n_hid_p), broadcasts over rows.
    h = jax.nn.sigmoid(h + b1_ref[...])
    # Layer 2: bf16 operands, f32 accumulate; output columns are unpadded.
    out = jnp.dot(h.astype(w2_ref.dtype), w2_ref[...],
                  preferred_element_type=jnp.float32)
    o_ref[...] = (out + b2_ref[...]).astype(o_ref.dtype)


def prepare_params(w1, b1, w2, b2, compute_dtype=jnp.bfloat16):
    """One-time (load-time) padding/casting of the parameters.

    * hidden dim padded to a multiple of 128 (lane-aligned intermediate);
      padded hidden lanes see sigmoid(0)=0.5 but hit zero W2 rows -> exact.
    * weights cast to bf16 for the MXU; biases kept f32 as (1, N) rows.
    * n_out is NOT padded: the output store stays narrow and unsliced.
    """
    n_input, n_hidden = w1.shape
    n_out = w2.shape[1]
    n_hidden_p = _round_up(n_hidden, 128)

    w1_p = jnp.pad(w1, ((0, 0), (0, n_hidden_p - n_hidden))).astype(compute_dtype)
    b1_p = jnp.pad(b1, (0, n_hidden_p - n_hidden)).reshape(1, -1).astype(jnp.float32)
    w2_p = jnp.pad(w2, ((0, n_hidden_p - n_hidden), (0, 0))).astype(compute_dtype)
    b2_p = b2.reshape(1, -1).astype(jnp.float32)
    return w1_p, b1_p, w2_p, b2_p


@functools.partial(jax.jit, static_argnames=("num_tiles",))
def network_forward(x, w1_p, b1_p, w2_p, b2_p, *, num_tiles: int = 1):
    """Fused 2-layer MLP forward.

    x:    (batch, n_input) f32
    w1_p: (n_input, n_hidden_p) bf16   b1_p: (1, n_hidden_p) f32
    w2_p: (n_hidden_p, n_out)   bf16   b2_p: (1, n_out)      f32
    Returns (batch, n_out) in x.dtype.

    num_tiles = number of grid steps (1 per TensorCore): 1 on v5e/v6e, 2 on v7x.
    """
    batch, n_input = x.shape
    n_hidden_p = w1_p.shape[1]
    n_out = w2_p.shape[1]
    out_dtype = x.dtype

    # One batch tile per TensorCore; tile rows must be a multiple of 8.
    tb = _round_up(pl.cdiv(batch, num_tiles), 8)
    batch_p = tb * num_tiles
    if batch_p != batch:
        x = jnp.pad(x, ((0, batch_p - batch), (0, 0)))

    out = pl.pallas_call(
        mlp_kernel,
        out_shape=jax.ShapeDtypeStruct((batch_p, n_out), out_dtype),
        grid=(num_tiles,),
        in_specs=[
            pl.BlockSpec((tb, n_input), lambda i: (i, 0)),          # x: tiled over batch
            pl.BlockSpec((n_input, n_hidden_p), lambda i: (0, 0)),  # W1: resident
            pl.BlockSpec((1, n_hidden_p), lambda i: (0, 0)),        # b1: resident
            pl.BlockSpec((n_hidden_p, n_out), lambda i: (0, 0)),    # W2: resident
            pl.BlockSpec((1, n_out), lambda i: (0, 0)),             # b2: resident
        ],
        out_specs=pl.BlockSpec((tb, n_out), lambda i: (i, 0)),
        compiler_params=pltpu.CompilerParams(
            dimension_semantics=("parallel",)),  # shards the batch across TCs on v7x
    )(x, w1_p, b1_p, w2_p, b2_p)

    if batch_p != batch:
        out = out[:batch]
    return out


def init_linear_params(key, in_features, out_features, dtype=jnp.float32):
    """Deterministic init mimicking torch.nn.Linear default (U(+/-1/sqrt(fan_in))).
    Weight is stored as (in_features, out_features) = torch weight transposed."""
    kw, kb = jax.random.split(key)
    bound = 1.0 / (in_features ** 0.5)
    w = jax.random.uniform(kw, (in_features, out_features), dtype,
                           minval=-bound, maxval=bound)
    b = jax.random.uniform(kb, (out_features,), dtype,
                           minval=-bound, maxval=bound)
    return w, b


def _default_num_tiles() -> int:
    """One grid step per TensorCore: 2 on v7x, 1 on single-TC chips."""
    try:
        kind = jax.devices()[0].device_kind.lower()
        if "v7" in kind:
            return 2
    except Exception:
        pass
    return 1


if __name__ == "__main__":
    # Small shapes consistent with the module; batch chosen so the per-TC
    # tiles are clean multiples of 8 with no padding or trailing slice.
    batch, n_input, n_hidden, n_out = 512, 32, 64, 16

    key = jax.random.PRNGKey(0)
    kx, k1, k2 = jax.random.split(key, 3)

    x = jax.random.normal(kx, (batch, n_input), jnp.float32)
    w1, b1 = init_linear_params(k1, n_input, n_hidden)
    w2, b2 = init_linear_params(k2, n_hidden, n_out)

    # Load-time (one-off) parameter padding/casting — not part of the hot path.
    w1_p, b1_p, w2_p, b2_p = prepare_params(w1, b1, w2, b2)
    w1_p, b1_p, w2_p, b2_p = jax.device_put((w1_p, b1_p, w2_p, b2_p))

    num_tiles = _default_num_tiles()
    y = network_forward(x, w1_p, b1_p, w2_p, b2_p, num_tiles=num_tiles)
    jax.block_until_ready(y)

    # Reference in plain JAX, mirroring the kernel's bf16-operand / f32-accumulate math.
    cd = jnp.bfloat16
    xb = x.astype(cd).astype(jnp.float32)
    w1b = w1.astype(cd).astype(jnp.float32)
    w2b = w2.astype(cd).astype(jnp.float32)
    h_ref = jax.nn.sigmoid(xb @ w1b + b1)
    ref = h_ref.astype(cd).astype(jnp.float32) @ w2b + b2

    assert y.shape == (batch, n_out)
    assert jnp.allclose(y, ref, atol=2e-3, rtol=2e-3), float(jnp.max(jnp.abs(y - ref)))

    print("KERNEL_OK")
</pallas_src>

<mosaic_0001>
module attributes {stable_mosaic.version = 11 : i64} {
  func.func @mlp_kernel(%arg0: i32, %arg1: memref<512x32xf32, #tpu.memory_space<vmem>>, %arg2: memref<32x128xbf16, #tpu.memory_space<vmem>>, %arg3: memref<1x128xf32, #tpu.memory_space<vmem>>, %arg4: memref<128x16xbf16, #tpu.memory_space<vmem>>, %arg5: memref<1x16xf32, #tpu.memory_space<vmem>>, %arg6: memref<512x16xf32, #tpu.memory_space<vmem>>) attributes {dimension_semantics = [#tpu.dimension_semantics<parallel>], iteration_bounds = array<i64: 1>, scalar_prefetch = 0 : i64, scratch_operands = 0 : i64, tpu.core_type = #tpu.core_type<tc>, window_params = [{transform_indices = @transform_0, window_bounds = array<i64: 512, 32>}, {pipeline_mode = #tpu.pipeline_mode<synchronous>, transform_indices = @transform_1, window_bounds = array<i64: 32, 128>}, {pipeline_mode = #tpu.pipeline_mode<synchronous>, transform_indices = @transform_2, window_bounds = array<i64: 1, 128>}, {pipeline_mode = #tpu.pipeline_mode<synchronous>, transform_indices = @transform_3, window_bounds = array<i64: 128, 16>}, {pipeline_mode = #tpu.pipeline_mode<synchronous>, transform_indices = @transform_4, window_bounds = array<i64: 1, 16>}, {transform_indices = @transform_5, window_bounds = array<i64: 512, 16>}]} {
    %c0 = arith.constant 0 : index
    %c0_0 = arith.constant 0 : index
    %0 = vector.load %arg1[%c0, %c0_0] : memref<512x32xf32, #tpu.memory_space<vmem>>, vector<512x32xf32>
    %1 = arith.truncf %0 : vector<512x32xf32> to vector<512x32xbf16>
    %c0_1 = arith.constant 0 : index
    %c0_2 = arith.constant 0 : index
    %2 = vector.load %arg2[%c0_1, %c0_2] : memref<32x128xbf16, #tpu.memory_space<vmem>>, vector<32x128xbf16>
    %cst = arith.constant dense<0.000000e+00> : vector<512x128xf32>
    %3 = tpu.matmul %1, %2, %cst {dimension_numbers = #tpu.dot_dimension_numbers<[1], [0], [0], [1], [0, 0, 1, 1], [], []>} : vector<512x32xbf16>, vector<32x128xbf16>, vector<512x128xf32> -> vector<512x128xf32>
    %c0_3 = arith.constant 0 : index
    %c0_4 = arith.constant 0 : index
    %4 = vector.load %arg3[%c0_3, %c0_4] : memref<1x128xf32, #tpu.memory_space<vmem>>, vector<1x128xf32>
    %5 = vector.broadcast %4 : vector<1x128xf32> to vector<512x128xf32>
    %6 = arith.addf %3, %5 : vector<512x128xf32>
    %7 = arith.negf %6 : vector<512x128xf32>
    %8 = math.exp %7 : vector<512x128xf32>
    %cst_5 = arith.constant 1.000000e+00 : f32
    %9 = vector.broadcast %cst_5 : f32 to vector<512x128xf32>
    %10 = arith.addf %9, %8 : vector<512x128xf32>
    %11 = arith.divf %9, %10 : vector<512x128xf32>
    %12 = arith.truncf %11 : vector<512x128xf32> to vector<512x128xbf16>
    %c0_6 = arith.constant 0 : index
    %c0_7 = arith.constant 0 : index
    %13 = vector.load %arg4[%c0_6, %c0_7] : memref<128x16xbf16, #tpu.memory_space<vmem>>, vector<128x16xbf16>
    %cst_8 = arith.constant dense<0.000000e+00> : vector<512x16xf32>
    %14 = tpu.matmul %12, %13, %cst_8 {dimension_numbers = #tpu.dot_dimension_numbers<[1], [0], [0], [1], [0, 0, 1, 1], [], []>} : vector<512x128xbf16>, vector<128x16xbf16>, vector<512x16xf32> -> vector<512x16xf32>
    %c0_9 = arith.constant 0 : index
    %c0_10 = arith.constant 0 : index
    %15 = vector.load %arg5[%c0_9, %c0_10] : memref<1x16xf32, #tpu.memory_space<vmem>>, vector<1x16xf32>
    %16 = vector.broadcast %15 : vector<1x16xf32> to vector<512x16xf32>
    %17 = arith.addf %14, %16 : vector<512x16xf32>
    %c0_11 = arith.constant 0 : index
    %c0_12 = arith.constant 0 : index
    %18 = vector.load %arg6[%c0_11, %c0_12] : memref<512x16xf32, #tpu.memory_space<vmem>>, vector<512x16xf32>
    tpu.vector_store %arg6[%c0_11, %c0_12], %17 {strides = array<i32>} : memref<512x16xf32, #tpu.memory_space<vmem>>, vector<512x16xf32>,
    return
  }
  func.func @transform_0(%arg0: i32) -> (i32, i32) {
    %c0_i32 = arith.constant 0 : i32
    %c0_i32_0 = arith.constant 0 : i32
    return %arg0, %c0_i32 : i32, i32
  }
  func.func @transform_1(%arg0: i32) -> (i32, i32) {
    %c0_i32 = arith.constant 0 : i32
    %c0_i32_0 = arith.constant 0 : i32
    %c0_i32_1 = arith.constant 0 : i32
    return %c0_i32, %c0_i32_0 : i32, i32
  }
  func.func @transform_2(%arg0: i32) -> (i32, i32) {
    %c0_i32 = arith.constant 0 : i32
    %c0_i32_0 = arith.constant 0 : i32
    %c0_i32_1 = arith.constant 0 : i32
    return %c0_i32, %c0_i32_0 : i32, i32
  }
  func.func @transform_3(%arg0: i32) -> (i32, i32) {
    %c0_i32 = arith.constant 0 : i32
    %c0_i32_0 = arith.constant 0 : i32
    %c0_i32_1 = arith.constant 0 : i32
    return %c0_i32, %c0_i32_0 : i32, i32
  }
  func.func @transform_4(%arg0: i32) -> (i32, i32) {
    %c0_i32 = arith.constant 0 : i32
    %c0_i32_0 = arith.constant 0 : i32
    %c0_i32_1 = arith.constant 0 : i32
    return %c0_i32, %c0_i32_0 : i32, i32
  }
  func.func @transform_5(%arg0: i32) -> (i32, i32) {
    %c0_i32 = arith.constant 0 : i32
    %c0_i32_0 = arith.constant 0 : i32
    return %arg0, %c0_i32 : i32, i32
  }
}

</mosaic_0001>

<bundles_post_ra>
// kernel: network_forward.1
= control target key start
LH: loop header
LB: loop body
LE: loop exit
PB: predicated region body
PF: predicated region fallthrough
CT: control target
= control target key end

     0   :  { %vm140_vm0 = vcmask 261120   ;;  %vm1302_vm1 = vcmask 130048   ;;  %s2661_s1 = inlined_call_operand.vmem [shape: bf16[32,128], index: 1, kind: input, shape index: {}]   ;;  %s2662_s0 = inlined_call_operand.vmem [shape: f32[512,32], index: 0, kind: input, shape index: {}]   ;;  %s2663_s3 = inlined_call_operand.vmem [shape: bf16[128,16], index: 3, kind: input, shape index: {}]   ;;  %s2664_s2 = inlined_call_operand.vmem [shape: f32[1,128], index: 2, kind: input, shape index: {}]   ;;  %s2665_s4 = inlined_call_operand.vmem [shape: f32[1,16], index: 4, kind: input, shape index: {}]   ;;  %s2666_s5 = inlined_call_operand.vmem [shape: f32[512,16], index: 5, kind: output, shape index: {}]  }
   0x1   :  { %v1717_v0 = vld [vmem:[%s2661_s1] sm:$0xff]   ;;  %v1718_v1 = vld [vmem:[%s2661_s1 + $0x8] sm:$0xff]   ;;  %v23_v5 = vld [vmem:[%s2662_s0 + $0x10] sm:$0xff] }
   0x2   :  { %1553 = vmatprep.subr.bf16.mxu0 %v1717_v0  ;;  %v21_v2 = vld [vmem:[%s2662_s0] sm:$0xff]  ;;  %v22_v3 = vld [vmem:[%s2662_s0 + $0x8] sm:$0xff]  ;;  %v24_v6 = vld [vmem:[%s2662_s0 + $0x18] sm:$0xff] }
   0x3   :  { %1554 = vmatpush3.bf16.msra.mxu0 %v1717_v0  ;;  %v85_v4 = vpack.c.bf16 %v22_v3, %v21_v2  ;;  %v25_v7 = vld [vmem:[%s2662_s0 + $0x20] sm:$0xff]  ;;  %v26_v8 = vld [vmem:[%s2662_s0 + $0x28] sm:$0xff]  ;;  %v86_v9 = vpack.c.bf16 %v24_v6, %v23_v5  ;;  %v27_v11 = vld [vmem:[%s2662_s0 + $0x30] sm:$0xff] }
   0x4   :  { %1555 = vmatprep.subr.bf16.mxu0 %v1718_v1  ;;  %v87_v10 = vpack.c.bf16 %v26_v8, %v25_v7  ;;  %v28_v12 = vld [vmem:[%s2662_s0 + $0x38] sm:$0xff]  ;;  %v29_v13 = vld [vmem:[%s2662_s0 + $0x40] sm:$0xff]  ;;  %v30_v14 = vld [vmem:[%s2662_s0 + $0x48] sm:$0xff] }
   0x5   :  { %1557 = vmatprep.mubr.msk.bf16.mxu0 %vm140_vm0, %v85_v4  ;;  %v88_v15 = vpack.c.bf16 %v28_v12, %v27_v11  ;;  %v89_v16 = vpack.c.bf16 %v30_v14, %v29_v13  ;;  %v31_v17 = vld [vmem:[%s2662_s0 + $0x50] sm:$0xff]  ;;  %v32_v18 = vld [vmem:[%s2662_s0 + $0x58] sm:$0xff]  ;;  %v33_v19 = vld [vmem:[%s2662_s0 + $0x60] sm:$0xff] }
   0x6   :  { %v34_v20 = vld [vmem:[%s2662_s0 + $0x68] sm:$0xff]  ;;  %v90_v21 = vpack.c.bf16 %v32_v18, %v31_v17  ;;  %v35_v23 = vld [vmem:[%s2662_s0 + $0x70] sm:$0xff]  ;;  %v36_v24 = vld [vmem:[%s2662_s0 + $0x78] sm:$0xff] }
   0x7   :  { %1556 = vmatpush3.bf16.msra.mxu0 %v1718_v1  ;;  %v91_v22 = vpack.c.bf16 %v34_v20, %v33_v19  ;;  %v37_v25 = vld [vmem:[%s2662_s0 + $0x80] sm:$0xff]  ;;  %v38_v26 = vld [vmem:[%s2662_s0 + $0x88] sm:$0xff]  ;;  %v92_v27 = vpack.c.bf16 %v36_v24, %v35_v23  ;;  %v39_v29 = vld [vmem:[%s2662_s0 + $0x90] sm:$0xff] }
   0x8   :  { %v93_v28 = vpack.c.bf16 %v38_v26, %v37_v25  ;;  %v40_v30 = vld [vmem:[%s2662_s0 + $0x98] sm:$0xff]  ;;  %v41_v31 = vld [vmem:[%s2662_s0 + $0xa0] sm:$0xff]  ;;  %v42_v32 = vld [vmem:[%s2662_s0 + $0xa8] sm:$0xff] }
   0x9   :  { %v94_v33 = vpack.c.bf16 %v40_v30, %v39_v29  ;;  %v95_v34 = vpack.c.bf16 %v42_v32, %v41_v31  ;;  %v43_v35 = vld [vmem:[%s2662_s0 + $0xb0] sm:$0xff]  ;;  %v44_v36 = vld [vmem:[%s2662_s0 + $0xb8] sm:$0xff]  ;;  %v45_v37 = vld [vmem:[%s2662_s0 + $0xc0] sm:$0xff] }
   0xa   :  { %1558 = vmatmul.mubr.msk.bf16.vlgmr.msra.gmra.mrb[0].mxu0 %vm140_vm0, %v86_v9  ;;  %v46_v38 = vld [vmem:[%s2662_s0 + $0xc8] sm:$0xff]  ;;  %v96_v39 = vpack.c.bf16 %v44_v36, %v43_v35  ;;  %v47_v41 = vld [vmem:[%s2662_s0 + $0xd0] sm:$0xff]  ;;  %v48_v42 = vld [vmem:[%s2662_s0 + $0xd8] sm:$0xff] }
   0xb   :  { %1561 = vmatprep.mubr.msk.bf16.mxu0 %vm140_vm0, %v87_v10  ;;  %v97_v40 = vpack.c.bf16 %v46_v38, %v45_v37  ;;  %v49_v43 = vld [vmem:[%s2662_s0 + $0xe0] sm:$0xff]  ;;  %v50_v44 = vld [vmem:[%s2662_s0 + $0xe8] sm:$0xff]  ;;  %v98_v45 = vpack.c.bf16 %v48_v42, %v47_v41  ;;  %v51_v47 = vld [vmem:[%s2662_s0 + $0xf0] sm:$0xff] }
   0xc   :  { %v99_v46 = vpack.c.bf16 %v50_v44, %v49_v43  ;;  %v52_v48 = vld [vmem:[%s2662_s0 + $0xf8] sm:$0xff]  ;;  %v53_v49 = vld [vmem:[%s2662_s0 + $0x100] sm:$0xff]  ;;  %v54_v50 = vld [vmem:[%s2662_s0 + $0x108] sm:$0xff] }
   0xd   :  { %v100_v51 = vpack.c.bf16 %v52_v48, %v51_v47  ;;  %v101_v52 = vpack.c.bf16 %v54_v50, %v53_v49  ;;  %v55_v53 = vld [vmem:[%s2662_s0 + $0x110] sm:$0xff]  ;;  %v56_v54 = vld [vmem:[%s2662_s0 + $0x118] sm:$0xff]  ;;  %v57_v55 = vld [vmem:[%s2662_s0 + $0x120] sm:$0xff] }
   0xe   :  { %v58_v56 = vld [vmem:[%s2662_s0 + $0x128] sm:$0xff]  ;;  %v102_v57 = vpack.c.bf16 %v56_v54, %v55_v53  ;;  %v59_v59 = vld [vmem:[%s2662_s0 + $0x130] sm:$0xff]  ;;  %v60_v60 = vld [vmem:[%s2662_s0 + $0x138] sm:$0xff] }
   0xf   :  { %v103_v58 = vpack.c.bf16 %v58_v56, %v57_v55  ;;  %v61_v61 = vld [vmem:[%s2662_s0 + $0x140] sm:$0xff]  ;;  %v62_v62 = vld [vmem:[%s2662_s0 + $0x148] sm:$0xff]  ;;  %v104_v63 = vpack.c.bf16 %v60_v60, %v59_v59  ;;  %v63_v1 = vld [vmem:[%s2662_s0 + $0x150] sm:$0xff] }
  0x10   :  { %v105_v0 = vpack.c.bf16 %v62_v62, %v61_v61  ;;  %v64_v2 = vld [vmem:[%s2662_s0 + $0x158] sm:$0xff]  ;;  %v65_v3 = vld [vmem:[%s2662_s0 + $0x160] sm:$0xff]  ;;  %v66_v4 = vld [vmem:[%s2662_s0 + $0x168] sm:$0xff] }
  0x11   :  { %v106_v5 = vpack.c.bf16 %v64_v2, %v63_v1  ;;  %v107_v6 = vpack.c.bf16 %v66_v4, %v65_v3  ;;  %v67_v7 = vld [vmem:[%s2662_s0 + $0x170] sm:$0xff]  ;;  %v68_v8 = vld [vmem:[%s2662_s0 + $0x178] sm:$0xff]  ;;  %v69_v9 = vld [vmem:[%s2662_s0 + $0x180] sm:$0xff] }
  0x12   :  { %1562 = vmatmul.mubr.msk.bf16.gmra.mrb[4].mxu0 %vm140_vm0, %v88_v15  ;;  %v70_v10 = vld [vmem:[%s2662_s0 + $0x188] sm:$0xff]  ;;  %v108_v11 = vpack.c.bf16 %v68_v8, %v67_v7  ;;  %v1719_v12 = vld [vmem:[%s2663_s3] sm:$0xff]   ;;  %v71_v14 = vld [vmem:[%s2662_s0 + $0x190] sm:$0xff] }
  0x13   :  { %1565 = vmatprep.mubr.msk.bf16.mxu0 %vm140_vm0, %v89_v16  ;;  %v109_v13 = vpack.c.bf16 %v70_v10, %v69_v9  ;;  %1621 = vmatprep.subr.bf16.mxu0 %v1719_v12  ;;  %v72_v15 = vld [vmem:[%s2662_s0 + $0x198] sm:$0xff]  ;;  %v1720_v16 = vld [vmem:[%s2663_s3 + $0x8] sm:$0xff]   ;;  %v73_v17 = vld [vmem:[%s2662_s0 + $0x1a0] sm:$0xff] }
  0x14   :  { %1701 = vmatprep.subr.bf16.mxu1 %v1719_v12  ;;  %1622 = vmatpush3.bf16.msra.mxu0 %v1719_v12  ;;  %v74_v18 = vld [vmem:[%s2662_s0 + $0x1a8] sm:$0xff]  ;;  %v110_v19 = vpack.c.bf16 %v72_v15, %v71_v14  ;;  %v1721_v20 = vld [vmem:[%s2663_s3 + $0x10] sm:$0xff]   ;;  %v76_v24 = vld [vmem:[%s2662_s0 + $0x1b8] sm:$0xff] }
  0x15   :  { %1709 = vmatpush3.bf16.msra.mxu1 %v1719_v12  ;;  %1623 = vmatprep.subr.bf16.mxu0 %v1720_v16  ;;  %v75_v23 = vld [vmem:[%s2662_s0 + $0x1b0] sm:$0xff]  ;;  %v77_v25 = vld [vmem:[%s2662_s0 + $0x1c0] sm:$0xff]  ;;  %v78_v26 = vld [vmem:[%s2662_s0 + $0x1c8] sm:$0xff] }
  0x16   :  { %1702 = vmatprep.subr.bf16.mxu1 %v1720_v16  ;;  %v1723_v29 = vld [vmem:[%s2663_s3 + $0x20] sm:$0xff]   ;;  %v79_v30 = vld [vmem:[%s2662_s0 + $0x1d0] sm:$0xff]  ;;  %v80_v31 = vld [vmem:[%s2662_s0 + $0x1d8] sm:$0xff] }
  0x17   :  { %v1724_v32 = vld [vmem:[%s2663_s3 + $0x28] sm:$0xff]   ;;  %v114_v35 = vpack.c.bf16 %v80_v31, %v79_v30  ;;  %v1725_v37 = vld [vmem:[%s2663_s3 + $0x30] sm:$0xff]   ;;  %v2270_v42 = vld [vmem:[%s2664_s2] ss:$0 sm:$0xff] }
  0x18   :  { %1624 = vmatpush3.bf16.msra.mxu0 %v1720_v16  ;;  %v83_v38 = vld [vmem:[%s2662_s0 + $0x1f0] sm:$0xff] }
  0x19   :  { %1710 = vmatpush3.bf16.msra.mxu1 %v1720_v16  ;;  %1625 = vmatprep.subr.bf16.mxu0 %v1721_v20 }
  0x1a   :  { %1566 = vmatmul.mubr.msk.bf16.gmra.mrb[8].mxu0 %vm140_vm0, %v90_v21  ;;  %v111_v21 = vpack.c.bf16 %v74_v18, %v73_v17  ;;  %1703 = vmatprep.subr.bf16.mxu1 %v1721_v20 }
  0x1b   :  { %1569 = vmatprep.mubr.msk.bf16.mxu0 %vm140_vm0, %v91_v22  ;;  %v1722_v22 = vld [vmem:[%s2663_s3 + $0x18] sm:$0xff]  }
  0x1c   :  { %1626 = vmatpush3.bf16.msra.mxu0 %v1721_v20 }
  0x1d   :  { %1711 = vmatpush3.bf16.msra.mxu1 %v1721_v20  ;;  %1627 = vmatprep.subr.bf16.mxu0 %v1722_v22 }
  0x1e   :  { %1704 = vmatprep.subr.bf16.mxu1 %v1722_v22 }
  0x20   :  { %1628 = vmatpush3.bf16.msra.mxu0 %v1722_v22 }
  0x21   :  { %1712 = vmatpush3.bf16.msra.mxu1 %v1722_v22  ;;  %1629 = vmatprep.subr.bf16.mxu0 %v1723_v29 }
  0x22   :  { %1570 = vmatmul.mubr.msk.bf16.gmra.mrb[12].mxu0 %vm140_vm0, %v92_v27  ;;  %v112_v27 = vpack.c.bf16 %v76_v24, %v75_v23  ;;  %1705 = vmatprep.subr.bf16.mxu1 %v1723_v29 }
  0x23   :  { %1573 = vmatprep.mubr.msk.bf16.mxu0 %vm140_vm0, %v93_v28  ;;  %v113_v28 = vpack.c.bf16 %v78_v26, %v77_v25 }
  0x24   :  { %1630 = vmatpush3.bf16.msra.mxu0 %v1723_v29 }
  0x25   :  { %1713 = vmatpush3.bf16.msra.mxu1 %v1723_v29  ;;  %1631 = vmatprep.subr.bf16.mxu0 %v1724_v32 }
  0x26   :  { %1706 = vmatprep.subr.bf16.mxu1 %v1724_v32 }
  0x28   :  { %1632 = vmatpush3.bf16.msra.mxu0 %v1724_v32 }
  0x29   :  { %1714 = vmatpush3.bf16.msra.mxu1 %v1724_v32  ;;  %1633 = vmatprep.subr.bf16.mxu0 %v1725_v37 }
  0x2a   :  { %1574 = vmatmul.mubr.msk.bf16.gmra.mrb[16].mxu0 %vm140_vm0, %v94_v33  ;;  %v81_v33 = vld [vmem:[%s2662_s0 + $0x1e0] sm:$0xff]  ;;  %1707 = vmatprep.subr.bf16.mxu1 %v1725_v37 }
  0x2b   :  { %1577 = vmatprep.mubr.msk.bf16.mxu0 %vm140_vm0, %v95_v34  ;;  %v82_v34 = vld [vmem:[%s2662_s0 + $0x1e8] sm:$0xff] }
  0x2c   :  { %v115_v36 = vpack.c.bf16 %v82_v34, %v81_v33  ;;  %1634 = vmatpush3.bf16.msra.mxu0 %v1725_v37 }
  0x2d   :  { %1715 = vmatpush3.bf16.msra.mxu1 %v1725_v37 }
  0x32   :  { %1578 = vmatmul.mubr.msk.bf16.gmra.mrb[20].mxu0 %vm140_vm0, %v96_v39  ;;  %v84_v39 = vld [vmem:[%s2662_s0 + $0x1f8] sm:$0xff] }
  0x33   :  { %1581 = vmatprep.mubr.msk.bf16.mxu0 %vm140_vm0, %v97_v40  ;;  %v1726_v40 = vld [vmem:[%s2663_s3 + $0x38] sm:$0xff]   ;;  %v116_v41 = vpack.c.bf16 %v84_v39, %v83_v38 }
  0x34   :  { %1635 = vmatprep.subr.bf16.mxu0 %v1726_v40  ;;  %1708 = vmatprep.subr.bf16.mxu1 %v1726_v40 }
  0x35   :  { %1716 = vmatpush3.bf16.msra.mxu1 %v1726_v40  ;;  %1636 = vmatpush3.bf16.msra.mxu0 %v1726_v40 }
  0x3a   :  { %1582 = vmatmul.mubr.msk.bf16.gmra.mrb[24].mxu0 %vm140_vm0, %v98_v45 }
  0x3b   :  { %1585 = vmatprep.mubr.msk.bf16.mxu0 %vm140_vm0, %v99_v46 }
  0x42   :  { %1586 = vmatmul.mubr.msk.bf16.gmra.mrb[28].mxu0 %vm140_vm0, %v100_v51 }
  0x43   :  { %1589 = vmatprep.mubr.msk.bf16.mxu0 %vm140_vm0, %v101_v52 }
  0x4a   :  { %1590 = vmatmul.mubr.msk.bf16.gmra.mrb[32].mxu0 %vm140_vm0, %v102_v57 }
  0x4b   :  { %1593 = vmatprep.mubr.msk.bf16.mxu0 %vm140_vm0, %v103_v58 }
  0x52   :  { %1594 = vmatmul.mubr.msk.bf16.gmra.mrb[36].mxu0 %vm140_vm0, %v104_v63 }
  0x53   :  { %1597 = vmatprep.mubr.msk.bf16.mxu0 %vm140_vm0, %v105_v0 }
  0x5a   :  { %1598 = vmatmul.mubr.msk.bf16.gmra.mrb[40].mxu0 %vm140_vm0, %v106_v5 }
  0x5b   :  { %1601 = vmatprep.mubr.msk.bf16.mxu0 %vm140_vm0, %v107_v6 }
  0x62   :  { %1602 = vmatmul.mubr.msk.bf16.gmra.mrb[44].mxu0 %vm140_vm0, %v108_v11 }
  0x63   :  { %1605 = vmatprep.mubr.msk.bf16.mxu0 %vm140_vm0, %v109_v13 }
  0x6a   :  { %1606 = vmatmul.mubr.msk.bf16.gmra.mrb[48].mxu0 %vm140_vm0, %v110_v19 }
  0x6b   :  { %1609 = vmatprep.mubr.msk.bf16.mxu0 %vm140_vm0, %v111_v21 }
  0x72   :  { %1610 = vmatmul.mubr.msk.bf16.gmra.mrb[52].mxu0 %vm140_vm0, %v112_v27 }
  0x73   :  { %1613 = vmatprep.mubr.msk.bf16.mxu0 %vm140_vm0, %v113_v28 }
  0x7a   :  { %1614 = vmatmul.mubr.msk.bf16.gmra.mrb[56].mxu0 %vm140_vm0, %v114_v35 }
  0x7b   :  { %1617 = vmatprep.mubr.msk.bf16.mxu0 %vm140_vm0, %v115_v36 }
  0x82   :  { %1618 = vmatmul.mubr.msk.bf16.gmra.mrb[60].mxu0 %vm140_vm0, %v116_v41 }
  0xdd   :  { %v1559_v43 = vpop.f32.mrb[0].mxu0 }
  0xde   :  { %v280_v44 = vadd.f32 %v1559_v43, %v2270_v42  ;;  %v271_v45 = vpop.f32.mrb[1].mxu0 }
  0xdf   :  { %v272_v46 = vadd.f32 %v2270_v42, %v271_v45  ;;  %v1560_v47 = vpop.f32.mrb[2].mxu0 }
  0xe0   :  { %v1408_v48 = vmul.f32 -1.442695, %v280_v44  ;;  %v283_v49 = vadd.f32 %v1560_v47, %v2270_v42  ;;  %v274_v50 = vpop.f32.mrb[3].mxu0 }
  0xe1   :  { %v1406_v51 = vmul.f32 -1.442695, %v272_v46  ;;  %v275_v52 = vadd.f32 %v2270_v42, %v274_v50 }
  0xe2   :  { %1727 = vpow2.f32 %v1408_v48  ;;  %v1409_v53 = vmul.f32 -1.442695, %v283_v49 }
  0xe3   :  { %1729 = vpow2.f32 %v1406_v51  ;;  %v1407_v54 = vmul.f32 -1.442695, %v275_v52 }
  0xe4   :  { %1731 = vpow2.f32 %v1409_v53 }
  0xe5   :  { %1733 = vpow2.f32 %v1407_v54  ;;  %v1563_v55 = vpop.f32.mrb[4].mxu0 }
  0xe6   :  { %v296_v56 = vadd.f32 %v1563_v55, %v2270_v42  ;;  %v287_v57 = vpop.f32.mrb[5].mxu0 }
  0xe7   :  { %v288_v58 = vadd.f32 %v2270_v42, %v287_v57  ;;  %v1564_v59 = vpop.f32.mrb[6].mxu0 }
  0xe8   :  { %v1412_v60 = vmul.f32 -1.442695, %v296_v56  ;;  %v299_v61 = vadd.f32 %v1564_v59, %v2270_v42  ;;  %v290_v62 = vpop.f32.mrb[7].mxu0 }
  0xe9   :  { %v1410_v63 = vmul.f32 -1.442695, %v288_v58  ;;  %v291_v0 = vadd.f32 %v2270_v42, %v290_v62 }
  0xea   :  { %1735 = vpow2.f32 %v1412_v60  ;;  %v1413_v1 = vmul.f32 -1.442695, %v299_v61 }
  0xeb   :  { %1737 = vpow2.f32 %v1410_v63  ;;  %v1411_v2 = vmul.f32 -1.442695, %v291_v0 }
  0xec   :  { %v1728_v3 = vpop.eup %1727  ;;  %1739 = vpow2.f32 %v1413_v1 }
  0xed   :  { %v1730_v4 = vpop.eup %1729  ;;  %v720_v5 = vadd.f32 1.0, %v1728_v3  ;;  %1741 = vpow2.f32 %v1411_v2  ;;  %v1567_v6 = vpop.f32.mrb[8].mxu0 }
  0xee   :  { %v1732_v7 = vpop.eup %1731  ;;  %v718_v8 = vadd.f32 1.0, %v1730_v4  ;;  %v312_v9 = vadd.f32 %v1567_v6, %v2270_v42  ;;  %v303_v10 = vpop.f32.mrb[9].mxu0 }
  0xef   :  { %v1734_v11 = vpop.eup %1733  ;;  %1743 = vrcp.f32 %v720_v5  ;;  %v721_v12 = vadd.f32 1.0, %v1732_v7  ;;  %v304_v13 = vadd.f32 %v2270_v42, %v303_v10  ;;  %v1568_v14 = vpop.f32.mrb[10].mxu0 }
  0xf0   :  { %1745 = vrcp.f32 %v718_v8  ;;  %v719_v15 = vadd.f32 1.0, %v1734_v11  ;;  %v1416_v16 = vmul.f32 -1.442695, %v312_v9  ;;  %v315_v17 = vadd.f32 %v1568_v14, %v2270_v42  ;;  %v306_v18 = vpop.f32.mrb[11].mxu0 }
  0xf1   :  { %1747 = vrcp.f32 %v721_v12  ;;  %v1414_v19 = vmul.f32 -1.442695, %v304_v13  ;;  %v307_v20 = vadd.f32 %v2270_v42, %v306_v18 }
  0xf2   :  { %1749 = vrcp.f32 %v719_v15  ;;  %v1417_v21 = vmul.f32 -1.442695, %v315_v17 }
  0xf3   :  { %1751 = vpow2.f32 %v1416_v16  ;;  %v1415_v22 = vmul.f32 -1.442695, %v307_v20 }
  0xf4   :  { %v1736_v23 = vpop.eup %1735  ;;  %1753 = vpow2.f32 %v1414_v19 }
  0xf5   :  { %v1738_v24 = vpop.eup %1737  ;;  %v724_v25 = vadd.f32 1.0, %v1736_v23  ;;  %1755 = vpow2.f32 %v1417_v21  ;;  %v1571_v26 = vpop.f32.mrb[12].mxu0 }
  0xf6   :  { %v1740_v27 = vpop.eup %1739  ;;  %v722_v28 = vadd.f32 1.0, %v1738_v24  ;;  %1757 = vpow2.f32 %v1415_v22  ;;  %v328_v29 = vadd.f32 %v1571_v26, %v2270_v42  ;;  %v319_v30 = vpop.f32.mrb[13].mxu0 }
  0xf7   :  { %v1742_v31 = vpop.eup %1741  ;;  %1759 = vrcp.f32 %v724_v25  ;;  %v725_v32 = vadd.f32 1.0, %v1740_v27  ;;  %v320_v33 = vadd.f32 %v2270_v42, %v319_v30  ;;  %v1572_v34 = vpop.f32.mrb[14].mxu0 }
  0xf8   :  { %1761 = vrcp.f32 %v722_v28  ;;  %v723_v35 = vadd.f32 1.0, %v1742_v31  ;;  %v1420_v36 = vmul.f32 -1.442695, %v328_v29  ;;  %v331_v37 = vadd.f32 %v1572_v34, %v2270_v42  ;;  %v322_v38 = vpop.f32.mrb[15].mxu0 }
  0xf9   :  { %v1744_v39 = vpop.eup %1743  ;;  %1763 = vrcp.f32 %v725_v32  ;;  %v1418_v40 = vmul.f32 -1.442695, %v320_v33  ;;  %v323_v41 = vadd.f32 %v2270_v42, %v322_v38 }
  0xfa   :  { %v1746_v43 = vpop.eup %1745  ;;  %1765 = vrcp.f32 %v723_v35  ;;  %v1421_v44 = vmul.f32 -1.442695, %v331_v37 }
  0xfb   :  { %v1748_v45 = vpop.eup %1747  ;;  %1767 = vpow2.f32 %v1420_v36  ;;  %v1419_v46 = vmul.f32 -1.442695, %v323_v41 }
  0xfc   :  { %v1750_v47 = vpop.eup %1749  ;;  %1769 = vpow2.f32 %v1418_v40  ;;  %v911_v48 = vpack.c.bf16 %v1748_v45, %v1744_v39 }
  0xfd   :  { %v1752_v49 = vpop.eup %1751  ;;  %1771 = vpow2.f32 %v1421_v44  ;;  %v1575_v50 = vpop.f32.mrb[16].mxu0  ;;  %v910_v51 = vpack.c.bf16 %v1750_v47, %v1746_v43 }
  0xfe   :  { %v1754_v52 = vpop.eup %1753  ;;  %v728_v53 = vadd.f32 1.0, %v1752_v49  ;;  %1773 = vpow2.f32 %v1419_v46  ;;  %v344_v54 = vadd.f32 %v1575_v50, %v2270_v42  ;;  %v335_v55 = vpop.f32.mrb[17].mxu0 }
  0xff   :  { %v1756_v56 = vpop.eup %1755  ;;  %v726_v57 = vadd.f32 1.0, %v1754_v52  ;;  %v336_v58 = vadd.f32 %v2270_v42, %v335_v55  ;;  %v1576_v59 = vpop.f32.mrb[18].mxu0  ;;  %1637 = vmatprep.mubr.bf16.mxu0 %v910_v51 }
 0x100   :  { %v1758_v60 = vpop.eup %1757  ;;  %1775 = vrcp.f32 %v728_v53  ;;  %v729_v61 = vadd.f32 1.0, %v1756_v56  ;;  %v1424_v62 = vmul.f32 -1.442695, %v344_v54  ;;  %v347_v63 = vadd.f32 %v1576_v59, %v2270_v42  ;;  %v338_v0 = vpop.f32.mrb[19].mxu0  ;;  %1638 = vmatmul.mubr.bf16.vlgmr.msra.gmra.mrb[64].mxu0 %v911_v48 }
 0x101   :  { %v1760_v1 = vpop.eup %1759  ;;  %1777 = vrcp.f32 %v726_v57  ;;  %v727_v2 = vadd.f32 1.0, %v1758_v60  ;;  %v1422_v3 = vmul.f32 -1.442695, %v336_v58  ;;  %v339_v4 = vadd.f32 %v2270_v42, %v338_v0 }
 0x102   :  { %v1762_v5 = vpop.eup %1761  ;;  %1779 = vrcp.f32 %v729_v61  ;;  %v1425_v6 = vmul.f32 -1.442695, %v347_v63 }
 0x103   :  { %v1764_v7 = vpop.eup %1763  ;;  %1781 = vrcp.f32 %v727_v2  ;;  %v1423_v8 = vmul.f32 -1.442695, %v339_v4 }
 0x104   :  { %v1766_v9 = vpop.eup %1765  ;;  %1783 = vpow2.f32 %v1424_v62  ;;  %v913_v10 = vpack.c.bf16 %v1764_v7, %v1760_v1 }
 0x105   :  { %v1768_v11 = vpop.eup %1767  ;;  %1785 = vpow2.f32 %v1422_v3  ;;  %v1579_v12 = vpop.f32.mrb[20].mxu0  ;;  %v912_v13 = vpack.c.bf16 %v1766_v9, %v1762_v5 }
 0x106   :  { %v1770_v14 = vpop.eup %1769  ;;  %v732_v15 = vadd.f32 1.0, %v1768_v11  ;;  %1787 = vpow2.f32 %v1425_v6  ;;  %v360_v16 = vadd.f32 %v1579_v12, %v2270_v42  ;;  %v351_v17 = vpop.f32.mrb[21].mxu0 }
 0x107   :  { %v1772_v18 = vpop.eup %1771  ;;  %v730_v19 = vadd.f32 1.0, %v1770_v14  ;;  %1789 = vpow2.f32 %v1423_v8  ;;  %v352_v20 = vadd.f32 %v2270_v42, %v351_v17  ;;  %v1580_v21 = vpop.f32.mrb[22].mxu0  ;;  %1641 = vmatprep.mubr.bf16.mxu1 %v912_v13 }
 0x108   :  { %v1774_v22 = vpop.eup %1773  ;;  %1791 = vrcp.f32 %v732_v15  ;;  %v733_v23 = vadd.f32 1.0, %v1772_v18  ;;  %v1428_v24 = vmul.f32 -1.442695, %v360_v16  ;;  %v363_v25 = vadd.f32 %v1580_v21, %v2270_v42  ;;  %v354_v26 = vpop.f32.mrb[23].mxu0  ;;  %1642 = vmatmul.mubr.bf16.vlgmr.msra.gmra.mrb[0].mxu1 %v913_v10 }
 0x109   :  { %1793 = vrcp.f32 %v730_v19  ;;  %v731_v27 = vadd.f32 1.0, %v1774_v22  ;;  %v1426_v28 = vmul.f32 -1.442695, %v352_v20  ;;  %v355_v29 = vadd.f32 %v2270_v42, %v354_v26 }
 0x10a   :  { %v1776_v30 = vpop.eup %1775  ;;  %1795 = vrcp.f32 %v733_v23  ;;  %v1429_v31 = vmul.f32 -1.442695, %v363_v25 }
 0x10b   :  { %v1778_v32 = vpop.eup %1777  ;;  %1797 = vrcp.f32 %v731_v27  ;;  %v1427_v33 = vmul.f32 -1.442695, %v355_v29 }
 0x10c   :  { %v1780_v34 = vpop.eup %1779  ;;  %1799 = vpow2.f32 %v1428_v24 }
 0x10d   :  { %v1782_v35 = vpop.eup %1781  ;;  %1801 = vpow2.f32 %v1426_v28  ;;  %v1583_v36 = vpop.f32.mrb[24].mxu0  ;;  %v915_v37 = vpack.c.bf16 %v1780_v34, %v1776_v30 }
 0x10e   :  { %v1784_v38 = vpop.eup %1783  ;;  %1803 = vpow2.f32 %v1429_v31  ;;  %v376_v39 = vadd.f32 %v1583_v36, %v2270_v42  ;;  %v367_v40 = vpop.f32.mrb[25].mxu0  ;;  %v914_v41 = vpack.c.bf16 %v1782_v35, %v1778_v32 }
 0x10f   :  { %v1786_v43 = vpop.eup %1785  ;;  %v736_v44 = vadd.f32 1.0, %v1784_v38  ;;  %1805 = vpow2.f32 %v1427_v33  ;;  %v368_v45 = vadd.f32 %v2270_v42, %v367_v40  ;;  %v1584_v46 = vpop.f32.mrb[26].mxu0 }
 0x110   :  { %v1788_v47 = vpop.eup %1787  ;;  %v734_v48 = vadd.f32 1.0, %v1786_v43  ;;  %v379_v49 = vadd.f32 %v1584_v46, %v2270_v42  ;;  %1645 = vmatprep.mubr.bf16.mxu1 %v914_v41  ;;  %v370_v50 = vpop.f32.mrb[27].mxu0  ;;  %v1432_v53 = vmul.f32 -1.442695, %v376_v39 }
 0x111   :  { %v1790_v51 = vpop.eup %1789  ;;  %1807 = vrcp.f32 %v736_v44  ;;  %v737_v52 = vadd.f32 1.0, %v1788_v47  ;;  %v371_v54 = vadd.f32 %v2270_v42, %v370_v50  ;;  %1646 = vmatmul.mubr.bf16.gmra.mrb[4].mxu1 %v915_v37  ;;  %v1430_v57 = vmul.f32 -1.442695, %v368_v45 }
 0x112   :  { %v1792_v55 = vpop.eup %1791  ;;  %1809 = vrcp.f32 %v734_v48  ;;  %v735_v56 = vadd.f32 1.0, %v1790_v51  ;;  %v1433_v59 = vmul.f32 -1.442695, %v379_v49 }
 0x113   :  { %v1794_v58 = vpop.eup %1793  ;;  %1811 = vrcp.f32 %v737_v52  ;;  %v1431_v61 = vmul.f32 -1.442695, %v371_v54 }
 0x114   :  { %v1796_v60 = vpop.eup %1795  ;;  %1813 = vrcp.f32 %v735_v56 }
 0x115   :  { %v1798_v62 = vpop.eup %1797  ;;  %1815 = vpow2.f32 %v1432_v53  ;;  %v1587_v63 = vpop.f32.mrb[28].mxu0  ;;  %v917_v0 = vpack.c.bf16 %v1796_v60, %v1792_v55 }
 0x116   :  { %v1800_v1 = vpop.eup %1799  ;;  %1817 = vpow2.f32 %v1430_v57  ;;  %v392_v2 = vadd.f32 %v1587_v63, %v2270_v42  ;;  %v383_v3 = vpop.f32.mrb[29].mxu0  ;;  %v916_v4 = vpack.c.bf16 %v1798_v62, %v1794_v58 }
 0x117   :  { %v1802_v5 = vpop.eup %1801  ;;  %v740_v6 = vadd.f32 1.0, %v1800_v1  ;;  %1819 = vpow2.f32 %v1433_v59  ;;  %v384_v7 = vadd.f32 %v2270_v42, %v383_v3  ;;  %v1588_v8 = vpop.f32.mrb[30].mxu0 }
 0x118   :  { %v1804_v9 = vpop.eup %1803  ;;  %v738_v10 = vadd.f32 1.0, %v1802_v5  ;;  %1821 = vpow2.f32 %v1431_v61  ;;  %v395_v11 = vadd.f32 %v1588_v8, %v2270_v42  ;;  %1649 = vmatprep.mubr.bf16.mxu1 %v916_v4  ;;  %v386_v12 = vpop.f32.mrb[31].mxu0  ;;  %v1436_v15 = vmul.f32 -1.442695, %v392_v2 }
 0x119   :  { %v1806_v13 = vpop.eup %1805  ;;  %1823 = vrcp.f32 %v740_v6  ;;  %v741_v14 = vadd.f32 1.0, %v1804_v9  ;;  %v387_v16 = vadd.f32 %v2270_v42, %v386_v12  ;;  %1650 = vmatmul.mubr.bf16.gmra.mrb[8].mxu1 %v917_v0  ;;  %v1434_v18 = vmul.f32 -1.442695, %v384_v7 }
 0x11a   :  { %1825 = vrcp.f32 %v738_v10  ;;  %v739_v17 = vadd.f32 1.0, %v1806_v13  ;;  %v1437_v20 = vmul.f32 -1.442695, %v395_v11 }
 0x11b   :  { %v1808_v19 = vpop.eup %1807  ;;  %1827 = vrcp.f32 %v741_v14  ;;  %v1435_v22 = vmul.f32 -1.442695, %v387_v16 }
 0x11c   :  { %v1810_v21 = vpop.eup %1809  ;;  %1829 = vrcp.f32 %v739_v17 }
 0x11d   :  { %v1812_v23 = vpop.eup %1811  ;;  %1831 = vpow2.f32 %v1436_v15  ;;  %v1591_v24 = vpop.f32.mrb[32].mxu0 }
 0x11e   :  { %v1814_v25 = vpop.eup %1813  ;;  %1833 = vpow2.f32 %v1434_v18  ;;  %v408_v26 = vadd.f32 %v1591_v24, %v2270_v42  ;;  %v399_v27 = vpop.f32.mrb[33].mxu0  ;;  %v919_v28 = vpack.c.bf16 %v1812_v23, %v1808_v19 }
 0x11f   :  { %v1816_v29 = vpop.eup %1815  ;;  %1835 = vpow2.f32 %v1437_v20  ;;  %v400_v30 = vadd.f32 %v2270_v42, %v399_v27  ;;  %v1592_v31 = vpop.f32.mrb[34].mxu0  ;;  %v918_v32 = vpack.c.bf16 %v1814_v25, %v1810_v21 }
 0x120   :  { %v1818_v33 = vpop.eup %1817  ;;  %v744_v34 = vadd.f32 1.0, %v1816_v29  ;;  %1837 = vpow2.f32 %v1435_v22  ;;  %v411_v35 = vadd.f32 %v1592_v31, %v2270_v42  ;;  %v402_v36 = vpop.f32.mrb[35].mxu0  ;;  %v1440_v43 = vmul.f32 -1.442695, %v408_v26 }
 0x121   :  { %v1820_v37 = vpop.eup %1819  ;;  %v742_v38 = vadd.f32 1.0, %v1818_v33  ;;  %1653 = vmatprep.mubr.bf16.mxu1 %v918_v32  ;;  %v403_v39 = vadd.f32 %v2270_v42, %v402_v36  ;;  %v1438_v46 = vmul.f32 -1.442695, %v400_v30 }
 0x122   :  { %v1822_v40 = vpop.eup %1821  ;;  %1839 = vrcp.f32 %v744_v34  ;;  %v745_v41 = vadd.f32 1.0, %v1820_v37  ;;  %1654 = vmatmul.mubr.bf16.gmra.mrb[12].mxu1 %v919_v28  ;;  %v1441_v48 = vmul.f32 -1.442695, %v411_v35 }
 0x123   :  { %v1824_v44 = vpop.eup %1823  ;;  %1841 = vrcp.f32 %v742_v38  ;;  %v743_v45 = vadd.f32 1.0, %v1822_v40  ;;  %v1439_v50 = vmul.f32 -1.442695, %v403_v39 }
 0x124   :  { %v1826_v47 = vpop.eup %1825  ;;  %1843 = vrcp.f32 %v745_v41 }
 0x125   :  { %v1828_v49 = vpop.eup %1827  ;;  %1845 = vrcp.f32 %v743_v45  ;;  %v1595_v51 = vpop.f32.mrb[36].mxu0 }
 0x126   :  { %v1830_v52 = vpop.eup %1829  ;;  %1847 = vpow2.f32 %v1440_v43  ;;  %v424_v53 = vadd.f32 %v1595_v51, %v2270_v42  ;;  %v415_v54 = vpop.f32.mrb[37].mxu0  ;;  %v921_v55 = vpack.c.bf16 %v1828_v49, %v1824_v44 }
 0x127   :  { %v1832_v56 = vpop.eup %1831  ;;  %1849 = vpow2.f32 %v1438_v46  ;;  %v416_v57 = vadd.f32 %v2270_v42, %v415_v54  ;;  %v1596_v58 = vpop.f32.mrb[38].mxu0  ;;  %v920_v59 = vpack.c.bf16 %v1830_v52, %v1826_v47 }
 0x128   :  { %v1834_v60 = vpop.eup %1833  ;;  %v748_v61 = vadd.f32 1.0, %v1832_v56  ;;  %1851 = vpow2.f32 %v1441_v48  ;;  %v427_v62 = vadd.f32 %v1596_v58, %v2270_v42  ;;  %v418_v63 = vpop.f32.mrb[39].mxu0  ;;  %v1444_v5 = vmul.f32 -1.442695, %v424_v53 }
 0x129   :  { %v1836_v0 = vpop.eup %1835  ;;  %v746_v1 = vadd.f32 1.0, %v1834_v60  ;;  %1853 = vpow2.f32 %v1439_v50  ;;  %1657 = vmatprep.mubr.bf16.mxu1 %v920_v59  ;;  %v419_v2 = vadd.f32 %v2270_v42, %v418_v63  ;;  %v1442_v7 = vmul.f32 -1.442695, %v416_v57 }
 0x12a   :  { %v1838_v3 = vpop.eup %1837  ;;  %1855 = vrcp.f32 %v748_v61  ;;  %v749_v4 = vadd.f32 1.0, %v1836_v0  ;;  %1658 = vmatmul.mubr.bf16.gmra.mrb[16].mxu1 %v921_v55  ;;  %v1445_v9 = vmul.f32 -1.442695, %v427_v62 }
 0x12b   :  { %1857 = vrcp.f32 %v746_v1  ;;  %v747_v6 = vadd.f32 1.0, %v1838_v3  ;;  %v1443_v11 = vmul.f32 -1.442695, %v419_v2 }
 0x12c   :  { %v1840_v8 = vpop.eup %1839  ;;  %1859 = vrcp.f32 %v749_v4 }
 0x12d   :  { %v1842_v10 = vpop.eup %1841  ;;  %1861 = vrcp.f32 %v747_v6  ;;  %v1599_v12 = vpop.f32.mrb[40].mxu0 }
 0x12e   :  { %v1844_v13 = vpop.eup %1843  ;;  %1863 = vpow2.f32 %v1444_v5  ;;  %v440_v14 = vadd.f32 %v1599_v12, %v2270_v42  ;;  %v431_v15 = vpop.f32.mrb[41].mxu0 }
 0x12f   :  { %v1846_v16 = vpop.eup %1845  ;;  %1865 = vpow2.f32 %v1442_v7  ;;  %v432_v17 = vadd.f32 %v2270_v42, %v431_v15  ;;  %v1600_v18 = vpop.f32.mrb[42].mxu0  ;;  %v923_v19 = vpack.c.bf16 %v1844_v13, %v1840_v8 }
 0x130   :  { %v1848_v20 = vpop.eup %1847  ;;  %1867 = vpow2.f32 %v1445_v9  ;;  %v1448_v21 = vmul.f32 -1.442695, %v440_v14  ;;  %v443_v22 = vadd.f32 %v1600_v18, %v2270_v42  ;;  %v922_v23 = vpack.c.bf16 %v1846_v16, %v1842_v10  ;;  %v434_v24 = vpop.f32.mrb[43].mxu0 }
 0x131   :  { %v1850_v25 = vpop.eup %1849  ;;  %v752_v26 = vadd.f32 1.0, %v1848_v20  ;;  %1869 = vpow2.f32 %v1443_v11  ;;  %v435_v27 = vadd.f32 %v2270_v42, %v434_v24  ;;  %v1446_v32 = vmul.f32 -1.442695, %v432_v17 }
 0x132   :  { %v1852_v28 = vpop.eup %1851  ;;  %v750_v29 = vadd.f32 1.0, %v1850_v25  ;;  %1871 = vpow2.f32 %v1448_v21  ;;  %1661 = vmatprep.mubr.bf16.mxu1 %v922_v23  ;;  %v1449_v35 = vmul.f32 -1.442695, %v443_v22 }
 0x133   :  { %v1854_v30 = vpop.eup %1853  ;;  %1873 = vrcp.f32 %v752_v26  ;;  %v753_v31 = vadd.f32 1.0, %v1852_v28  ;;  %1662 = vmatmul.mubr.bf16.gmra.mrb[20].mxu1 %v923_v19  ;;  %v1447_v37 = vmul.f32 -1.442695, %v435_v27 }
 0x134   :  { %v1856_v33 = vpop.eup %1855  ;;  %1875 = vrcp.f32 %v750_v29  ;;  %v751_v34 = vadd.f32 1.0, %v1854_v30 }
 0x135   :  { %v1858_v36 = vpop.eup %1857  ;;  %1877 = vrcp.f32 %v753_v31  ;;  %v1603_v38 = vpop.f32.mrb[44].mxu0 }
 0x136   :  { %v1860_v39 = vpop.eup %1859  ;;  %1879 = vrcp.f32 %v751_v34  ;;  %v456_v40 = vadd.f32 %v1603_v38, %v2270_v42  ;;  %v447_v41 = vpop.f32.mrb[45].mxu0 }
 0x137   :  { %v1862_v43 = vpop.eup %1861  ;;  %1881 = vpow2.f32 %v1446_v32  ;;  %v1604_v44 = vpop.f32.mrb[46].mxu0  ;;  %v925_v45 = vpack.c.bf16 %v1860_v39, %v1856_v33  ;;  %v448_v48 = vadd.f32 %v2270_v42, %v447_v41 }
 0x138   :  { %v1864_v46 = vpop.eup %1863  ;;  %1883 = vpow2.f32 %v1449_v35  ;;  %v1452_v47 = vmul.f32 -1.442695, %v456_v40  ;;  %v924_v49 = vpack.c.bf16 %v1862_v43, %v1858_v36  ;;  %v450_v50 = vpop.f32.mrb[47].mxu0  ;;  %v459_v53 = vadd.f32 %v1604_v44, %v2270_v42 }
 0x139   :  { %v1866_v51 = vpop.eup %1865  ;;  %v756_v52 = vadd.f32 1.0, %v1864_v46  ;;  %1885 = vpow2.f32 %v1447_v37  ;;  %v451_v56 = vadd.f32 %v2270_v42, %v450_v50  ;;  %v1450_v61 = vmul.f32 -1.442695, %v448_v48 }
 0x13a   :  { %v1868_v54 = vpop.eup %1867  ;;  %v754_v55 = vadd.f32 1.0, %v1866_v51  ;;  %1887 = vpow2.f32 %v1452_v47  ;;  %1665 = vmatprep.mubr.bf16.mxu1 %v924_v49  ;;  %v1453_v0 = vmul.f32 -1.442695, %v459_v53 }
 0x13b   :  { %v1870_v57 = vpop.eup %1869  ;;  %1889 = vrcp.f32 %v756_v52  ;;  %v757_v58 = vadd.f32 1.0, %v1868_v54  ;;  %1666 = vmatmul.mubr.bf16.gmra.mrb[24].mxu1 %v925_v45  ;;  %v1451_v3 = vmul.f32 -1.442695, %v451_v56 }
 0x13c   :  { %v1872_v59 = vpop.eup %1871  ;;  %1891 = vrcp.f32 %v754_v55  ;;  %v755_v60 = vadd.f32 1.0, %v1870_v57 }
 0x13d   :  { %v1874_v62 = vpop.eup %1873  ;;  %1893 = vrcp.f32 %v757_v58  ;;  %v760_v63 = vadd.f32 1.0, %v1872_v59  ;;  %v1607_v1 = vpop.f32.mrb[48].mxu0 }
 0x13e   :  { %v1876_v2 = vpop.eup %1875  ;;  %1895 = vrcp.f32 %v755_v60  ;;  %v472_v4 = vadd.f32 %v1607_v1, %v2270_v42  ;;  %v463_v5 = vpop.f32.mrb[49].mxu0 }
 0x13f   :  { %v1878_v6 = vpop.eup %1877  ;;  %1897 = vrcp.f32 %v760_v63  ;;  %v1608_v7 = vpop.f32.mrb[50].mxu0  ;;  %v464_v10 = vadd.f32 %v2270_v42, %v463_v5 }
 0x140   :  { %v1880_v8 = vpop.eup %1879  ;;  %1899 = vpow2.f32 %v1450_v61  ;;  %v1456_v9 = vmul.f32 -1.442695, %v472_v4  ;;  %v466_v11 = vpop.f32.mrb[51].mxu0  ;;  %v927_v12 = vpack.c.bf16 %v1878_v6, %v1874_v62  ;;  %v475_v14 = vadd.f32 %v1608_v7, %v2270_v42 }
 0x141   :  { %v1882_v13 = vpop.eup %1881  ;;  %1901 = vpow2.f32 %v1453_v0  ;;  %v926_v15 = vpack.c.bf16 %v1880_v8, %v1876_v2  ;;  %v467_v18 = vadd.f32 %v2270_v42, %v466_v11  ;;  %v1454_v23 = vmul.f32 -1.442695, %v464_v10 }
 0x142   :  { %v1884_v16 = vpop.eup %1883  ;;  %v758_v17 = vadd.f32 1.0, %v1882_v13  ;;  %1903 = vpow2.f32 %v1451_v3  ;;  %v1457_v26 = vmul.f32 -1.442695, %v475_v14 }
 0x143   :  { %v1886_v19 = vpop.eup %1885  ;;  %v761_v20 = vadd.f32 1.0, %v1884_v16  ;;  %1905 = vpow2.f32 %v1456_v9  ;;  %1669 = vmatprep.mubr.bf16.mxu1 %v926_v15  ;;  %v1455_v29 = vmul.f32 -1.442695, %v467_v18 }
 0x144   :  { %v1888_v21 = vpop.eup %1887  ;;  %1907 = vrcp.f32 %v758_v17  ;;  %v759_v22 = vadd.f32 1.0, %v1886_v19  ;;  %1670 = vmatmul.mubr.bf16.gmra.mrb[28].mxu1 %v927_v12 }
 0x145   :  { %v1890_v24 = vpop.eup %1889  ;;  %1909 = vrcp.f32 %v761_v20  ;;  %v764_v25 = vadd.f32 1.0, %v1888_v21  ;;  %v1611_v27 = vpop.f32.mrb[52].mxu0 }
 0x146   :  { %v1892_v28 = vpop.eup %1891  ;;  %1911 = vrcp.f32 %v759_v22  ;;  %v488_v30 = vadd.f32 %v1611_v27, %v2270_v42  ;;  %v479_v31 = vpop.f32.mrb[53].mxu0 }
 0x147   :  { %v1894_v32 = vpop.eup %1893  ;;  %1913 = vrcp.f32 %v764_v25  ;;  %v480_v33 = vadd.f32 %v2270_v42, %v479_v31  ;;  %v1612_v34 = vpop.f32.mrb[54].mxu0 }
 0x148   :  { %v1896_v35 = vpop.eup %1895  ;;  %1915 = vpow2.f32 %v1454_v23  ;;  %v1460_v36 = vmul.f32 -1.442695, %v488_v30  ;;  %v482_v37 = vpop.f32.mrb[55].mxu0  ;;  %v929_v38 = vpack.c.bf16 %v1894_v32, %v1890_v24  ;;  %v491_v41 = vadd.f32 %v1612_v34, %v2270_v42 }
 0x149   :  { %v1898_v39 = vpop.eup %1897  ;;  %1917 = vpow2.f32 %v1457_v26  ;;  %v1458_v40 = vmul.f32 -1.442695, %v480_v33  ;;  %v928_v43 = vpack.c.bf16 %v1896_v35, %v1892_v28  ;;  %v483_v45 = vadd.f32 %v2270_v42, %v482_v37 }
 0x14a   :  { %v1900_v44 = vpop.eup %1899  ;;  %1919 = vpow2.f32 %v1455_v29  ;;  %v1461_v52 = vmul.f32 -1.442695, %v491_v41 }
 0x14b   :  { %v1902_v46 = vpop.eup %1901  ;;  %v762_v47 = vadd.f32 1.0, %v1900_v44  ;;  %1921 = vpow2.f32 %v1460_v36  ;;  %1673 = vmatprep.mubr.bf16.mxu1 %v928_v43  ;;  %v1459_v56 = vmul.f32 -1.442695, %v483_v45 }
 0x14c   :  { %v1904_v48 = vpop.eup %1903  ;;  %v765_v49 = vadd.f32 1.0, %v1902_v46  ;;  %1923 = vpow2.f32 %v1458_v40  ;;  %1674 = vmatmul.mubr.bf16.gmra.mrb[32].mxu1 %v929_v38 }
 0x14d   :  { %v1906_v50 = vpop.eup %1905  ;;  %1925 = vrcp.f32 %v762_v47  ;;  %v763_v51 = vadd.f32 1.0, %v1904_v48  ;;  %v1615_v53 = vpop.f32.mrb[56].mxu0 }
 0x14e   :  { %v1908_v54 = vpop.eup %1907  ;;  %1927 = vrcp.f32 %v765_v49  ;;  %v768_v55 = vadd.f32 1.0, %v1906_v50  ;;  %v504_v57 = vadd.f32 %v1615_v53, %v2270_v42  ;;  %v495_v58 = vpop.f32.mrb[57].mxu0 }
 0x14f   :  { %v1910_v59 = vpop.eup %1909  ;;  %1929 = vrcp.f32 %v763_v51  ;;  %v496_v60 = vadd.f32 %v2270_v42, %v495_v58  ;;  %v1616_v61 = vpop.f32.mrb[58].mxu0 }
 0x150   :  { %v1912_v62 = vpop.eup %1911  ;;  %1931 = vrcp.f32 %v768_v55  ;;  %v1464_v63 = vmul.f32 -1.442695, %v504_v57  ;;  %v498_v0 = vpop.f32.mrb[59].mxu0  ;;  %v931_v1 = vpack.c.bf16 %v1910_v59, %v1898_v39  ;;  %v507_v6 = vadd.f32 %v1616_v61, %v2270_v42 }
 0x151   :  { %v1914_v2 = vpop.eup %1913  ;;  %1933 = vpow2.f32 %v1461_v52  ;;  %v1462_v3 = vmul.f32 -1.442695, %v496_v60  ;;  %v930_v4 = vpack.c.bf16 %v1912_v62, %v1908_v54  ;;  %v499_v9 = vadd.f32 %v2270_v42, %v498_v0 }
 0x152   :  { %v1916_v5 = vpop.eup %1915  ;;  %1935 = vpow2.f32 %v1459_v56  ;;  %v1465_v17 = vmul.f32 -1.442695, %v507_v6 }
 0x153   :  { %v1918_v7 = vpop.eup %1917  ;;  %v766_v8 = vadd.f32 1.0, %v1916_v5  ;;  %1937 = vpow2.f32 %v1464_v63  ;;  %1677 = vmatprep.mubr.bf16.mxu1 %v930_v4  ;;  %v1463_v22 = vmul.f32 -1.442695, %v499_v9 }
 0x154   :  { %v1920_v10 = vpop.eup %1919  ;;  %v769_v11 = vadd.f32 1.0, %v1918_v7  ;;  %1939 = vpow2.f32 %v1462_v3  ;;  %1678 = vmatmul.mubr.bf16.gmra.mrb[36].mxu1 %v931_v1 }
 0x155   :  { %v1922_v12 = vpop.eup %1921  ;;  %1941 = vrcp.f32 %v766_v8  ;;  %v767_v13 = vadd.f32 1.0, %v1920_v10  ;;  %v1619_v14 = vpop.f32.mrb[60].mxu0 }
 0x156   :  { %v1924_v15 = vpop.eup %1923  ;;  %1943 = vrcp.f32 %v769_v11  ;;  %v772_v16 = vadd.f32 1.0, %v1922_v12  ;;  %v520_v18 = vadd.f32 %v1619_v14, %v2270_v42  ;;  %v511_v19 = vpop.f32.mrb[61].mxu0 }
 0x157   :  { %v1926_v20 = vpop.eup %1925  ;;  %1945 = vrcp.f32 %v767_v13  ;;  %v770_v21 = vadd.f32 1.0, %v1924_v15  ;;  %v512_v23 = vadd.f32 %v2270_v42, %v511_v19  ;;  %v1620_v24 = vpop.f32.mrb[62].mxu0 }
 0x158   :  { %v1928_v25 = vpop.eup %1927  ;;  %1947 = vrcp.f32 %v772_v16  ;;  %v1468_v26 = vmul.f32 -1.442695, %v520_v18  ;;  %v514_v27 = vpop.f32.mrb[63].mxu0  ;;  %v523_v32 = vadd.f32 %v1620_v24, %v2270_v42  ;;  %v2339_v16 = vld [vmem:[%s2665_s4] ss:$0 sm:$0xff] }
 0x159   :  { %v1930_v28 = vpop.eup %1929  ;;  %1949 = vrcp.f32 %v770_v21  ;;  %v1466_v29 = vmul.f32 -1.442695, %v512_v23  ;;  %v933_v30 = vpack.c.bf16 %v1928_v25, %v1914_v2  ;;  %v515_v35 = vadd.f32 %v2270_v42, %v514_v27 }
 0x15a   :  { %v1932_v31 = vpop.eup %1931  ;;  %1951 = vpow2.f32 %v1465_v17  ;;  %v932_v33 = vpack.c.bf16 %v1930_v28, %v1926_v20  ;;  %v1469_v41 = vmul.f32 -1.442695, %v523_v32 }
 0x15b   :  { %v1934_v34 = vpop.eup %1933  ;;  %1953 = vpow2.f32 %v1463_v22  ;;  %v1467_v44 = vmul.f32 -1.442695, %v515_v35 }
 0x15c   :  { %v1936_v36 = vpop.eup %1935  ;;  %v773_v37 = vadd.f32 1.0, %v1934_v34  ;;  %1955 = vpow2.f32 %v1468_v26  ;;  %1681 = vmatprep.mubr.bf16.mxu1 %v932_v33 }
 0x15d   :  { %v1938_v38 = vpop.eup %1937  ;;  %v771_v39 = vadd.f32 1.0, %v1936_v36  ;;  %1957 = vpow2.f32 %v1466_v29  ;;  %1682 = vmatmul.mubr.bf16.gmra.mrb[40].mxu1 %v933_v30 }
 0x15e   :  { %v1940_v40 = vpop.eup %1939  ;;  %1959 = vrcp.f32 %v773_v37  ;;  %v776_v47 = vadd.f32 1.0, %v1938_v38 }
 0x15f   :  { %v1942_v43 = vpop.eup %1941  ;;  %1961 = vrcp.f32 %v771_v39  ;;  %v774_v42 = vadd.f32 1.0, %v1940_v40 }
 0x160   :  { %v1944_v45 = vpop.eup %1943  ;;  %1963 = vpow2.f32 %v1469_v41 }
 0x161   :  { %v1946_v46 = vpop.eup %1945  ;;  %v935_v48 = vpack.c.bf16 %v1944_v45, %v1932_v31  ;;  %1965 = vpow2.f32 %v1467_v44 }
 0x162   :  { %v1948_v49 = vpop.eup %1947  ;;  %v934_v50 = vpack.c.bf16 %v1946_v46, %v1942_v43  ;;  %1967 = vrcp.f32 %v776_v47 }
 0x163   :  { %v1950_v51 = vpop.eup %1949  ;;  %1969 = vrcp.f32 %v774_v42 }
 0x164   :  { %v1952_v52 = vpop.eup %1951  ;;  %1685 = vmatprep.mubr.bf16.mxu1 %v934_v50 }
 0x165   :  { %v1954_v53 = vpop.eup %1953  ;;  %v777_v54 = vadd.f32 1.0, %v1952_v52  ;;  %1686 = vmatmul.mubr.bf16.gmra.mrb[44].mxu1 %v935_v48 }
 0x166   :  { %v1956_v55 = vpop.eup %1955  ;;  %v775_v56 = vadd.f32 1.0, %v1954_v53 }
 0x167   :  { %v1958_v57 = vpop.eup %1957  ;;  %1971 = vrcp.f32 %v777_v54  ;;  %v780_v60 = vadd.f32 1.0, %v1956_v55 }
 0x168   :  { %v1960_v58 = vpop.eup %1959  ;;  %1973 = vrcp.f32 %v775_v56  ;;  %v778_v62 = vadd.f32 1.0, %v1958_v57 }
 0x169   :  { %v1962_v59 = vpop.eup %1961  ;;  %v937_v61 = vpack.c.bf16 %v1960_v58, %v1948_v49  ;;  %1975 = vrcp.f32 %v780_v60 }
 0x16a   :  { %v936_v63 = vpack.c.bf16 %v1962_v59, %v1950_v51  ;;  %v1964_v0 = vpop.eup %1963  ;;  %1977 = vrcp.f32 %v778_v62 }
 0x16b   :  { %v1966_v1 = vpop.eup %1965  ;;  %v781_v2 = vadd.f32 1.0, %v1964_v0 }
 0x16c   :  { %1689 = vmatprep.mubr.bf16.mxu1 %v936_v63  ;;  %v779_v3 = vadd.f32 1.0, %v1966_v1  ;;  %v1968_v4 = vpop.eup %1967 }
 0x16d   :  { %1690 = vmatmul.mubr.bf16.gmra.mrb[48].mxu1 %v937_v61  ;;  %1979 = vrcp.f32 %v781_v2  ;;  %v1970_v5 = vpop.eup %1969 }
 0x16e   :  { %1981 = vrcp.f32 %v779_v3 }
 0x171   :  { %v1972_v6 = vpop.eup %1971 }
 0x172   :  { %v1974_v7 = vpop.eup %1973  ;;  %v939_v8 = vpack.c.bf16 %v1972_v6, %v1968_v4 }
 0x173   :  { %v938_v9 = vpack.c.bf16 %v1974_v7, %v1970_v5  ;;  %v1976_v10 = vpop.eup %1975 }
 0x174   :  { %v1978_v11 = vpop.eup %1977 }
 0x175   :  { %1693 = vmatprep.mubr.bf16.mxu1 %v938_v9 }
 0x176   :  { %1694 = vmatmul.mubr.bf16.gmra.mrb[52].mxu1 %v939_v8 }
 0x177   :  { %v1980_v12 = vpop.eup %1979 }
 0x178   :  { %v1982_v13 = vpop.eup %1981  ;;  %v941_v14 = vpack.c.bf16 %v1980_v12, %v1976_v10 }
 0x179   :  { %v940_v15 = vpack.c.bf16 %v1982_v13, %v1978_v11 }
 0x17b   :  { %1697 = vmatprep.mubr.bf16.mxu1 %v940_v15 }
 0x17e   :  { %1698 = vmatmul.mubr.bf16.gmra.mrb[56].mxu1 %v941_v14 }
 0x1d3   :  { %v1639_v17 = vpop.f32.mrb[64].mxu0 }
 0x1d4   :  { %v1056_v18 = vadd.f32 %v1639_v17, %v2339_v16  ;;  %v1047_v19 = vpop.f32.mrb[65].mxu0 }
 0x1d5   :  { %v1048_v20 = vadd.f32 %v2339_v16, %v1047_v19  ;;  %v1640_v21 = vpop.f32.mrb[66].mxu0 }
 0x1d6   :  { %1305 = vst.msk [vmem:[%s2666_s5 + $0x10] sm:$0xff] %vm1302_vm1, %v1056_v18  ;;  %v1059_v22 = vadd.f32 %v1640_v21, %v2339_v16  ;;  %v1050_v23 = vpop.f32.mrb[67].mxu0 }
 0x1d7   :  { %1303 = vst.msk [vmem:[%s2666_s5] sm:$0xff] %vm1302_vm1, %v1048_v20  ;;  %v1051_v24 = vadd.f32 %v2339_v16, %v1050_v23 }
 0x1d8   :  { %1306 = vst.msk [vmem:[%s2666_s5 + $0x18] sm:$0xff] %vm1302_vm1, %v1059_v22 }
 0x1d9   :  { %1304 = vst.msk [vmem:[%s2666_s5 + $0x8] sm:$0xff] %vm1302_vm1, %v1051_v24 }
 0x1db   :  { %v1643_v25 = vpop.f32.mrb[0].mxu1 }
 0x1dc   :  { %v1072_v26 = vadd.f32 %v1643_v25, %v2339_v16  ;;  %v1063_v27 = vpop.f32.mrb[1].mxu1 }
 0x1dd   :  { %v1064_v28 = vadd.f32 %v2339_v16, %v1063_v27  ;;  %v1644_v29 = vpop.f32.mrb[2].mxu1 }
 0x1de   :  { %1309 = vst.msk [vmem:[%s2666_s5 + $0x30] sm:$0xff] %vm1302_vm1, %v1072_v26  ;;  %v1075_v30 = vadd.f32 %v1644_v29, %v2339_v16  ;;  %v1066_v31 = vpop.f32.mrb[3].mxu1 }
 0x1df   :  { %1307 = vst.msk [vmem:[%s2666_s5 + $0x20] sm:$0xff] %vm1302_vm1, %v1064_v28  ;;  %v1067_v32 = vadd.f32 %v2339_v16, %v1066_v31 }
 0x1e0   :  { %1310 = vst.msk [vmem:[%s2666_s5 + $0x38] sm:$0xff] %vm1302_vm1, %v1075_v30 }
 0x1e1   :  { %1308 = vst.msk [vmem:[%s2666_s5 + $0x28] sm:$0xff] %vm1302_vm1, %v1067_v32 }
 0x1e4   :  { %v1647_v33 = vpop.f32.mrb[4].mxu1 }
 0x1e5   :  { %v1088_v34 = vadd.f32 %v1647_v33, %v2339_v16  ;;  %v1079_v35 = vpop.f32.mrb[5].mxu1 }
 0x1e6   :  { %v1080_v36 = vadd.f32 %v2339_v16, %v1079_v35  ;;  %v1648_v37 = vpop.f32.mrb[6].mxu1 }
 0x1e7   :  { %1313 = vst.msk [vmem:[%s2666_s5 + $0x50] sm:$0xff] %vm1302_vm1, %v1088_v34  ;;  %v1091_v38 = vadd.f32 %v1648_v37, %v2339_v16  ;;  %v1082_v39 = vpop.f32.mrb[7].mxu1 }
 0x1e8   :  { %1311 = vst.msk [vmem:[%s2666_s5 + $0x40] sm:$0xff] %vm1302_vm1, %v1080_v36  ;;  %v1083_v40 = vadd.f32 %v2339_v16, %v1082_v39 }
 0x1e9   :  { %1314 = vst.msk [vmem:[%s2666_s5 + $0x58] sm:$0xff] %vm1302_vm1, %v1091_v38 }
 0x1ea   :  { %1312 = vst.msk [vmem:[%s2666_s5 + $0x48] sm:$0xff] %vm1302_vm1, %v1083_v40 }
 0x1ec   :  { %v1651_v41 = vpop.f32.mrb[8].mxu1 }
 0x1ed   :  { %v1104_v43 = vadd.f32 %v1651_v41, %v2339_v16  ;;  %v1095_v44 = vpop.f32.mrb[9].mxu1 }
 0x1ee   :  { %v1096_v45 = vadd.f32 %v2339_v16, %v1095_v44  ;;  %v1652_v46 = vpop.f32.mrb[10].mxu1 }
 0x1ef   :  { %1317 = vst.msk [vmem:[%s2666_s5 + $0x70] sm:$0xff] %vm1302_vm1, %v1104_v43  ;;  %v1107_v47 = vadd.f32 %v1652_v46, %v2339_v16  ;;  %v1098_v48 = vpop.f32.mrb[11].mxu1 }
 0x1f0   :  { %1315 = vst.msk [vmem:[%s2666_s5 + $0x60] sm:$0xff] %vm1302_vm1, %v1096_v45  ;;  %v1099_v49 = vadd.f32 %v2339_v16, %v1098_v48 }
 0x1f1   :  { %1318 = vst.msk [vmem:[%s2666_s5 + $0x78] sm:$0xff] %vm1302_vm1, %v1107_v47 }
 0x1f2   :  { %1316 = vst.msk [vmem:[%s2666_s5 + $0x68] sm:$0xff] %vm1302_vm1, %v1099_v49 }
 0x1f5   :  { %v1655_v42 = vpop.f32.mrb[12].mxu1 }
 0x1f6   :  { %v1120_v50 = vadd.f32 %v1655_v42, %v2339_v16  ;;  %v1111_v51 = vpop.f32.mrb[13].mxu1 }
 0x1f7   :  { %v1112_v52 = vadd.f32 %v2339_v16, %v1111_v51  ;;  %v1656_v53 = vpop.f32.mrb[14].mxu1 }
 0x1f8   :  { %1321 = vst.msk [vmem:[%s2666_s5 + $0x90] sm:$0xff] %vm1302_vm1, %v1120_v50  ;;  %v1123_v54 = vadd.f32 %v1656_v53, %v2339_v16  ;;  %v1114_v55 = vpop.f32.mrb[15].mxu1 }
 0x1f9   :  { %1319 = vst.msk [vmem:[%s2666_s5 + $0x80] sm:$0xff] %vm1302_vm1, %v1112_v52  ;;  %v1115_v56 = vadd.f32 %v2339_v16, %v1114_v55 }
 0x1fa   :  { %1322 = vst.msk [vmem:[%s2666_s5 + $0x98] sm:$0xff] %vm1302_vm1, %v1123_v54 }
 0x1fb   :  { %1320 = vst.msk [vmem:[%s2666_s5 + $0x88] sm:$0xff] %vm1302_vm1, %v1115_v56 }
 0x1fd   :  { %v1659_v57 = vpop.f32.mrb[16].mxu1 }
 0x1fe   :  { %v1136_v58 = vadd.f32 %v1659_v57, %v2339_v16  ;;  %v1127_v59 = vpop.f32.mrb[17].mxu1 }
 0x1ff   :  { %v1128_v60 = vadd.f32 %v2339_v16, %v1127_v59  ;;  %v1660_v61 = vpop.f32.mrb[18].mxu1 }
 0x200   :  { %1325 = vst.msk [vmem:[%s2666_s5 + $0xb0] sm:$0xff] %vm1302_vm1, %v1136_v58  ;;  %v1139_v62 = vadd.f32 %v1660_v61, %v2339_v16  ;;  %v1130_v63 = vpop.f32.mrb[19].mxu1 }
 0x201   :  { %1323 = vst.msk [vmem:[%s2666_s5 + $0xa0] sm:$0xff] %vm1302_vm1, %v1128_v60  ;;  %v1131_v0 = vadd.f32 %v2339_v16, %v1130_v63 }
 0x202   :  { %1326 = vst.msk [vmem:[%s2666_s5 + $0xb8] sm:$0xff] %vm1302_vm1, %v1139_v62 }
 0x203   :  { %1324 = vst.msk [vmem:[%s2666_s5 + $0xa8] sm:$0xff] %vm1302_vm1, %v1131_v0 }
 0x206   :  { %v1663_v1 = vpop.f32.mrb[20].mxu1 }
 0x207   :  { %v1152_v2 = vadd.f32 %v1663_v1, %v2339_v16  ;;  %v1143_v3 = vpop.f32.mrb[21].mxu1 }
 0x208   :  { %v1144_v4 = vadd.f32 %v2339_v16, %v1143_v3  ;;  %v1664_v5 = vpop.f32.mrb[22].mxu1 }
 0x209   :  { %1329 = vst.msk [vmem:[%s2666_s5 + $0xd0] sm:$0xff] %vm1302_vm1, %v1152_v2  ;;  %v1155_v6 = vadd.f32 %v1664_v5, %v2339_v16  ;;  %v1146_v7 = vpop.f32.mrb[23].mxu1 }
 0x20a   :  { %1327 = vst.msk [vmem:[%s2666_s5 + $0xc0] sm:$0xff] %vm1302_vm1, %v1144_v4  ;;  %v1147_v8 = vadd.f32 %v2339_v16, %v1146_v7 }
 0x20b   :  { %1330 = vst.msk [vmem:[%s2666_s5 + $0xd8] sm:$0xff] %vm1302_vm1, %v1155_v6 }
 0x20c   :  { %1328 = vst.msk [vmem:[%s2666_s5 + $0xc8] sm:$0xff] %vm1302_vm1, %v1147_v8 }
 0x20e   :  { %v1667_v9 = vpop.f32.mrb[24].mxu1 }
 0x20f   :  { %v1168_v10 = vadd.f32 %v1667_v9, %v2339_v16  ;;  %v1159_v11 = vpop.f32.mrb[25].mxu1 }
 0x210   :  { %v1160_v12 = vadd.f32 %v2339_v16, %v1159_v11  ;;  %v1668_v13 = vpop.f32.mrb[26].mxu1 }
 0x211   :  { %1333 = vst.msk [vmem:[%s2666_s5 + $0xf0] sm:$0xff] %vm1302_vm1, %v1168_v10  ;;  %v1171_v14 = vadd.f32 %v1668_v13, %v2339_v16  ;;  %v1162_v15 = vpop.f32.mrb[27].mxu1 }
 0x212   :  { %1331 = vst.msk [vmem:[%s2666_s5 + $0xe0] sm:$0xff] %vm1302_vm1, %v1160_v12  ;;  %v1163_v17 = vadd.f32 %v2339_v16, %v1162_v15 }
 0x213   :  { %1334 = vst.msk [vmem:[%s2666_s5 + $0xf8] sm:$0xff] %vm1302_vm1, %v1171_v14 }
 0x214   :  { %1332 = vst.msk [vmem:[%s2666_s5 + $0xe8] sm:$0xff] %vm1302_vm1, %v1163_v17 }
 0x217   :  { %v1671_v18 = vpop.f32.mrb[28].mxu1 }
 0x218   :  { %v1184_v19 = vadd.f32 %v1671_v18, %v2339_v16  ;;  %v1175_v20 = vpop.f32.mrb[29].mxu1 }
 0x219   :  { %v1176_v21 = vadd.f32 %v2339_v16, %v1175_v20  ;;  %v1672_v22 = vpop.f32.mrb[30].mxu1 }
 0x21a   :  { %1337 = vst.msk [vmem:[%s2666_s5 + $0x110] sm:$0xff] %vm1302_vm1, %v1184_v19  ;;  %v1187_v23 = vadd.f32 %v1672_v22, %v2339_v16  ;;  %v1178_v24 = vpop.f32.mrb[31].mxu1 }
 0x21b   :  { %1335 = vst.msk [vmem:[%s2666_s5 + $0x100] sm:$0xff] %vm1302_vm1, %v1176_v21  ;;  %v1179_v25 = vadd.f32 %v2339_v16, %v1178_v24 }
 0x21c   :  { %1338 = vst.msk [vmem:[%s2666_s5 + $0x118] sm:$0xff] %vm1302_vm1, %v1187_v23 }
 0x21d   :  { %1336 = vst.msk [vmem:[%s2666_s5 + $0x108] sm:$0xff] %vm1302_vm1, %v1179_v25 }
 0x21f   :  { %v1675_v26 = vpop.f32.mrb[32].mxu1 }
 0x220   :  { %v1200_v27 = vadd.f32 %v1675_v26, %v2339_v16  ;;  %v1191_v28 = vpop.f32.mrb[33].mxu1 }
 0x221   :  { %v1192_v29 = vadd.f32 %v2339_v16, %v1191_v28  ;;  %v1676_v30 = vpop.f32.mrb[34].mxu1 }
 0x222   :  { %1341 = vst.msk [vmem:[%s2666_s5 + $0x130] sm:$0xff] %vm1302_vm1, %v1200_v27  ;;  %v1203_v31 = vadd.f32 %v1676_v30, %v2339_v16  ;;  %v1194_v32 = vpop.f32.mrb[35].mxu1 }
 0x223   :  { %1339 = vst.msk [vmem:[%s2666_s5 + $0x120] sm:$0xff] %vm1302_vm1, %v1192_v29  ;;  %v1195_v33 = vadd.f32 %v2339_v16, %v1194_v32 }
 0x224   :  { %1342 = vst.msk [vmem:[%s2666_s5 + $0x138] sm:$0xff] %vm1302_vm1, %v1203_v31 }
 0x225   :  { %1340 = vst.msk [vmem:[%s2666_s5 + $0x128] sm:$0xff] %vm1302_vm1, %v1195_v33 }
 0x227   :  { %v1679_v34 = vpop.f32.mrb[36].mxu1 }
 0x228   :  { %v1216_v35 = vadd.f32 %v1679_v34, %v2339_v16  ;;  %v1207_v36 = vpop.f32.mrb[37].mxu1 }
 0x229   :  { %v1208_v37 = vadd.f32 %v2339_v16, %v1207_v36  ;;  %v1680_v38 = vpop.f32.mrb[38].mxu1 }
 0x22a   :  { %1345 = vst.msk [vmem:[%s2666_s5 + $0x150] sm:$0xff] %vm1302_vm1, %v1216_v35  ;;  %v1219_v39 = vadd.f32 %v1680_v38, %v2339_v16  ;;  %v1210_v40 = vpop.f32.mrb[39].mxu1 }
 0x22b   :  { %1343 = vst.msk [vmem:[%s2666_s5 + $0x140] sm:$0xff] %vm1302_vm1, %v1208_v37  ;;  %v1211_v41 = vadd.f32 %v2339_v16, %v1210_v40 }
 0x22c   :  { %1346 = vst.msk [vmem:[%s2666_s5 + $0x158] sm:$0xff] %vm1302_vm1, %v1219_v39 }
 0x22d   :  { %1344 = vst.msk [vmem:[%s2666_s5 + $0x148] sm:$0xff] %vm1302_vm1, %v1211_v41 }
 0x230   :  { %v1683_v43 = vpop.f32.mrb[40].mxu1 }
 0x231   :  { %v1232_v44 = vadd.f32 %v1683_v43, %v2339_v16  ;;  %v1223_v45 = vpop.f32.mrb[41].mxu1 }
 0x232   :  { %v1224_v46 = vadd.f32 %v2339_v16, %v1223_v45  ;;  %v1684_v47 = vpop.f32.mrb[42].mxu1 }
 0x233   :  { %1349 = vst.msk [vmem:[%s2666_s5 + $0x170] sm:$0xff] %vm1302_vm1, %v1232_v44  ;;  %v1235_v48 = vadd.f32 %v1684_v47, %v2339_v16  ;;  %v1226_v49 = vpop.f32.mrb[43].mxu1 }
 0x234   :  { %1347 = vst.msk [vmem:[%s2666_s5 + $0x160] sm:$0xff] %vm1302_vm1, %v1224_v46  ;;  %v1227_v42 = vadd.f32 %v2339_v16, %v1226_v49 }
 0x235   :  { %1350 = vst.msk [vmem:[%s2666_s5 + $0x178] sm:$0xff] %vm1302_vm1, %v1235_v48 }
 0x236   :  { %1348 = vst.msk [vmem:[%s2666_s5 + $0x168] sm:$0xff] %vm1302_vm1, %v1227_v42 }
 0x238   :  { %v1687_v50 = vpop.f32.mrb[44].mxu1 }
 0x239   :  { %v1248_v51 = vadd.f32 %v1687_v50, %v2339_v16  ;;  %v1239_v52 = vpop.f32.mrb[45].mxu1 }
 0x23a   :  { %v1240_v53 = vadd.f32 %v2339_v16, %v1239_v52  ;;  %v1688_v54 = vpop.f32.mrb[46].mxu1 }
 0x23b   :  { %1353 = vst.msk [vmem:[%s2666_s5 + $0x190] sm:$0xff] %vm1302_vm1, %v1248_v51  ;;  %v1251_v55 = vadd.f32 %v1688_v54, %v2339_v16  ;;  %v1242_v56 = vpop.f32.mrb[47].mxu1 }
 0x23c   :  { %1351 = vst.msk [vmem:[%s2666_s5 + $0x180] sm:$0xff] %vm1302_vm1, %v1240_v53  ;;  %v1243_v57 = vadd.f32 %v2339_v16, %v1242_v56 }
 0x23d   :  { %1354 = vst.msk [vmem:[%s2666_s5 + $0x198] sm:$0xff] %vm1302_vm1, %v1251_v55 }
 0x23e   :  { %1352 = vst.msk [vmem:[%s2666_s5 + $0x188] sm:$0xff] %vm1302_vm1, %v1243_v57 }
 0x240   :  { %v1691_v58 = vpop.f32.mrb[48].mxu1 }
 0x241   :  { %v1264_v59 = vadd.f32 %v1691_v58, %v2339_v16  ;;  %v1255_v60 = vpop.f32.mrb[49].mxu1 }
 0x242   :  { %v1256_v61 = vadd.f32 %v2339_v16, %v1255_v60  ;;  %v1692_v62 = vpop.f32.mrb[50].mxu1 }
 0x243   :  { %1357 = vst.msk [vmem:[%s2666_s5 + $0x1b0] sm:$0xff] %vm1302_vm1, %v1264_v59  ;;  %v1267_v63 = vadd.f32 %v1692_v62, %v2339_v16  ;;  %v1258_v0 = vpop.f32.mrb[51].mxu1 }
 0x244   :  { %1355 = vst.msk [vmem:[%s2666_s5 + $0x1a0] sm:$0xff] %vm1302_vm1, %v1256_v61  ;;  %v1259_v1 = vadd.f32 %v2339_v16, %v1258_v0 }
 0x245   :  { %1358 = vst.msk [vmem:[%s2666_s5 + $0x1b8] sm:$0xff] %vm1302_vm1, %v1267_v63 }
 0x246   :  { %1356 = vst.msk [vmem:[%s2666_s5 + $0x1a8] sm:$0xff] %vm1302_vm1, %v1259_v1 }
 0x249   :  { %v1695_v2 = vpop.f32.mrb[52].mxu1 }
 0x24a   :  { %v1280_v3 = vadd.f32 %v1695_v2, %v2339_v16  ;;  %v1271_v4 = vpop.f32.mrb[53].mxu1 }
 0x24b   :  { %v1272_v5 = vadd.f32 %v2339_v16, %v1271_v4  ;;  %v1696_v6 = vpop.f32.mrb[54].mxu1 }
 0x24c   :  { %1361 = vst.msk [vmem:[%s2666_s5 + $0x1d0] sm:$0xff] %vm1302_vm1, %v1280_v3  ;;  %v1283_v7 = vadd.f32 %v1696_v6, %v2339_v16  ;;  %v1274_v8 = vpop.f32.mrb[55].mxu1 }
 0x24d   :  { %1359 = vst.msk [vmem:[%s2666_s5 + $0x1c0] sm:$0xff] %vm1302_vm1, %v1272_v5  ;;  %v1275_v9 = vadd.f32 %v2339_v16, %v1274_v8 }
 0x24e   :  { %1362 = vst.msk [vmem:[%s2666_s5 + $0x1d8] sm:$0xff] %vm1302_vm1, %v1283_v7 }
 0x24f   :  { %1360 = vst.msk [vmem:[%s2666_s5 + $0x1c8] sm:$0xff] %vm1302_vm1, %v1275_v9 }
 0x251   :  { %v1699_v10 = vpop.f32.mrb[56].mxu1 }
 0x252   :  { %v1296_v11 = vadd.f32 %v1699_v10, %v2339_v16  ;;  %v1287_v12 = vpop.f32.mrb[57].mxu1 }
 0x253   :  { %v1288_v13 = vadd.f32 %v2339_v16, %v1287_v12  ;;  %v1700_v14 = vpop.f32.mrb[58].mxu1 }
 0x254   :  { %1365 = vst.msk [vmem:[%s2666_s5 + $0x1f0] sm:$0xff] %vm1302_vm1, %v1296_v11  ;;  %v1299_v15 = vadd.f32 %v1700_v14, %v2339_v16  ;;  %v1290_v17 = vpop.f32.mrb[59].mxu1 }
 0x255   :  { %1363 = vst.msk [vmem:[%s2666_s5 + $0x1e0] sm:$0xff] %vm1302_vm1, %v1288_v13  ;;  %v1291_v18 = vadd.f32 %v2339_v16, %v1290_v17 }
 0x256   :  { %1366 = vst.msk [vmem:[%s2666_s5 + $0x1f8] sm:$0xff] %vm1302_vm1, %v1299_v15 }
 0x257   :  { %1364 = vst.msk [vmem:[%s2666_s5 + $0x1e8] sm:$0xff] %vm1302_vm1, %v1291_v18 }

</bundles_post_ra>
